<compile_context>
chip_gen: v6e
topology: v6e:2x2x1
jax: 0.10.0
libtpu: 0.0.40
codegen_flags: <defaults>
</compile_context>

<pallas_src>
import functools
import math

import jax
import jax.numpy as jnp
from jax.experimental import pallas as pl
from jax.experimental.pallas import tpu as pltpu

_LANE = 128          # lane width (last dim)
_SUBLANE_BF16 = 16   # bf16 sublane packing (second-to-last dim)


def _round_up(n, m):
    return ((n + m - 1) // m) * m


def _densenet_kernel(*refs, num_layers):
    """Whole-network forward on one (TB, K0) activation tile; activation stays in VMEM.

    refs layout: x_ref, w_ref[0..L-1], shift_ref[0..L-1], o_ref
      x_ref:        (TB, K0)        bf16  padded input tile
      w_ref[l]:     (Kp[l], Np[l])  bf16  per-layer fused weight (BN scale folded in)
      shift_ref[l]: (1, Np[l])      f32   per-layer fused shift (bias*scale + BN shift)
      o_ref:        (TB, Np[L-1])   bf16  padded output tile (head layer)
    """
    x_ref = refs[0]
    w_refs = refs[1:1 + num_layers]
    s_refs = refs[1 + num_layers:1 + 2 * num_layers]
    o_ref = refs[1 + 2 * num_layers]

    h = x_ref[...]                                    # bf16
    y = None
    # TODO(synk): for deep nets (L > ~8) switch this trace-time unroll to a grid axis
    #             over layers (per-layer weight streaming) or lax.fori_loop to keep code
    #             size / vreg pressure flat.
    for l in range(num_layers):                       # unrolled at trace time
        y = jnp.dot(h, w_refs[l][...],
                    preferred_element_type=jnp.float32)       # MXU, f32 accumulation
        y = y + s_refs[l][...]                        # fused bias / BN shift (f32)
        if l < num_layers - 1:
            y = jnp.maximum(y, 0.0)                   # ReLU (hidden blocks only)
            h = y.astype(jnp.bfloat16)                # bf16 only as next MXU input
    o_ref[...] = y.astype(o_ref.dtype)


def _choose_batch_tiling(batch, block_rows):
    """Pick (TB, B_pad): largest hardware-friendly tile <= block_rows that still yields a
    >=2-step batch grid when the batch allows it (dual-TC sharding on v7x)."""
    b_aligned = _round_up(batch, _SUBLANE_BF16)
    # user cap, floored to 256-row multiples (full MXU M-tile on v6e/v7x) when large;
    # v5e's 128-wide MXU is happy with anything 16-aligned.
    if block_rows >= 256:
        cap = (block_rows // 256) * 256
    else:
        cap = _round_up(max(block_rows, 1), _SUBLANE_BF16)
    cap = max(cap, _SUBLANE_BF16)

    if b_aligned >= 2 * _SUBLANE_BF16:
        align = 256 if b_aligned >= 2 * 256 else _SUBLANE_BF16
        half = _round_up((b_aligned + 1) // 2, align)   # largest tile with >=2 steps
        tb = min(cap, half)
    else:
        tb = b_aligned                                   # tiny batch: single tile
    tb = min(tb, b_aligned)
    b_pad = _round_up(b_aligned, tb)
    return tb, b_pad


def densenet_forward(x_pad_bf16, weights, shifts, *, block_rows=512,
                     out_dtype=jnp.bfloat16, x_buffers=None):
    """x_pad_bf16: (B, K0) bf16 feature-padded input.
    weights[l]: (Kp[l], Np[l]) bf16; shifts[l]: (1, Np[l]) f32.
    Returns (B, Np[-1]) padded output in `out_dtype`."""
    B, K0 = x_pad_bf16.shape
    L = len(weights)
    n_last = weights[-1].shape[1]
    out_itemsize = jnp.dtype(out_dtype).itemsize

    TB, B_pad = _choose_batch_tiling(B, block_rows)
    if B_pad != B:
        x_pad_bf16 = jnp.pad(x_pad_bf16, ((0, B_pad - B), (0, 0)))
    grid = (B_pad // TB,)

    # Explicit VMEM budget: double-buffered x/out tiles + resident weights/shifts
    # (worst case double-buffered) + headroom. Scoped defaults (16/32 MiB) are far below
    # physical and would otherwise cap TB / weight residency.
    w_bytes = sum(int(w.size) * 2 for w in weights)          # bf16
    s_bytes = sum(int(s.size) * 4 for s in shifts)           # f32
    io_bytes = 2 * TB * K0 * 2 + 2 * TB * n_last * out_itemsize
    need = io_bytes + 2 * (w_bytes + s_bytes)
    vmem_limit = int(min(max(need * 5 // 4, 8 << 20) + (2 << 20), 100 << 20))
    # TODO(synk): if w_bytes exceeds ~20-24 MiB (v7x has only 64 MiB VMEM per TC), stream
    #             per-layer weights through an inner "arbitrary" grid axis instead of
    #             keeping the whole stack resident.

    flops = 2 * B_pad * sum(int(w.shape[0]) * int(w.shape[1]) for w in weights)
    bytes_accessed = (B_pad * K0 * 2 + B_pad * n_last * out_itemsize
                      + w_bytes + s_bytes)

    kernel = functools.partial(_densenet_kernel, num_layers=L)
    out_shape = jax.ShapeDtypeStruct((B_pad, n_last), out_dtype)
    compiler_params = pltpu.CompilerParams(
        # batch axis is embarrassingly parallel -> shard across TCs on v7x
        dimension_semantics=("parallel",),
        vmem_limit_bytes=vmem_limit,
    )
    cost = pl.CostEstimate(flops=flops, transcendentals=0,
                           bytes_accessed=bytes_accessed)

    def build(single_buffer_resident):
        def resident_spec(shape):
            idx = lambda b: (0,) * len(shape)
            if single_buffer_resident:
                # constant index_map -> a second pipeline buffer is pure VMEM waste
                return pl.BlockSpec(shape, idx, pipeline_mode=pl.Buffered(1))
            return pl.BlockSpec(shape, idx)

        if x_buffers is not None and single_buffer_resident:
            # deeper input buffering (e.g. 3 on v5e) to hide lower HBM bandwidth
            x_spec = pl.BlockSpec((TB, K0), lambda b: (b, 0),
                                  pipeline_mode=pl.Buffered(x_buffers))
        else:
            x_spec = pl.BlockSpec((TB, K0), lambda b: (b, 0))

        in_specs = ([x_spec]
                    + [resident_spec(w.shape) for w in weights]
                    + [resident_spec(s.shape) for s in shifts])
        return pl.pallas_call(
            kernel,
            out_shape=out_shape,
            grid_spec=pltpu.PrefetchScalarGridSpec(
                num_scalar_prefetch=0,
                grid=grid,
                in_specs=in_specs,
                out_specs=pl.BlockSpec((TB, n_last), lambda b: (b, 0)),
            ),
            compiler_params=compiler_params,
            cost_estimate=cost,
        )

    try:
        out = build(single_buffer_resident=True)(x_pad_bf16, *weights, *shifts)
    except Exception:
        # pipeline_mode=pl.Buffered(1) not supported on this jax/libtpu build: fall back
        # to default double-buffered resident blocks (identical results, 2x weight VMEM).
        out = build(single_buffer_resident=False)(x_pad_bf16, *weights, *shifts)
    return out[:B]


class DenseNetPallas:
    """Pallas re-implementation of the PyTorch DenseNet forward pass (eval mode)."""

    def __init__(self, d_input, d_output, hidden_list, drop_on, p_drop,
                 batchnorm, ab_norm, Rs_parm, key, block_rows=512,
                 out_dtype=jnp.bfloat16):
        self.ab_norm = ab_norm
        self.Rs_parm = Rs_parm
        self.d_input = d_input
        self.d_output = d_output
        self.batchnorm = batchnorm
        self.drop_on = drop_on            # eval mode: dropout is a no-op
        self.num_layers = len(hidden_list) + 1
        self.block_rows = block_rows
        self.out_dtype = out_dtype

        dims = [d_input] + list(hidden_list) + [d_output]
        eps = 1e-5

        # Per-layer padding (not one common D_max): layer-0 K only needs bf16 sublane
        # (16) granularity; every other K must equal the previous layer's lane-dense
        # (128-multiple) N padding so activations chain without slicing.
        k_pads = [_round_up(d_input, _SUBLANE_BF16)] + [
            _round_up(d, _LANE) for d in dims[1:-1]]
        n_pads = [_round_up(d, _LANE) for d in dims[1:]]
        self.k0_pad = k_pads[0]
        self.n_last_pad = n_pads[-1]

        weights, shifts = [], []
        self.layers_f32 = []              # unpadded f32 copy for a loose sanity reference
        for i in range(self.num_layers):
            d_in, d_out = dims[i], dims[i + 1]
            kp, npad = k_pads[i], n_pads[i]
            key, kw, kb, kg, kbe, km, kv = jax.random.split(key, 7)
            # deterministic "Kaiming-uniform-like" init, matching nn.Linear shapes
            bound = 1.0 / math.sqrt(d_in)
            W = jax.random.uniform(kw, (d_in, d_out), jnp.float32, -bound, bound)
            b = jax.random.uniform(kb, (d_out,), jnp.float32, -bound, bound)

            is_head = (i == self.num_layers - 1)
            if (not is_head) and self.batchnorm:
                gamma = 1.0 + 0.1 * jax.random.normal(kg, (d_out,), jnp.float32)
                beta = 0.1 * jax.random.normal(kbe, (d_out,), jnp.float32)
                r_mean = 0.1 * jax.random.normal(km, (d_out,), jnp.float32)
                r_var = jnp.abs(jax.random.normal(kv, (d_out,), jnp.float32)) + 0.5
                s = gamma / jnp.sqrt(r_var + eps)      # BN scale
                t = beta - r_mean * s                  # BN shift
            else:
                s = jnp.ones((d_out,), jnp.float32)
                t = jnp.zeros((d_out,), jnp.float32)

            # fold BN scale into W columns and Linear bias into the shift:
            #   (xW + b)*s + t = x(W*s) + (b*s + t)
            W_fused = W * s[None, :]
            shift = b * s + t
            self.layers_f32.append((W_fused, shift, not is_head))

            # zero-padded W rows/cols + zero shift keep padded lanes at exactly 0 through
            # every layer (relu(0)=0), so no masking is needed anywhere.
            Wp = jnp.zeros((kp, npad), jnp.float32).at[:d_in, :d_out].set(W_fused)
            sp = jnp.zeros((1, npad), jnp.float32).at[0, :d_out].set(shift)
            weights.append(Wp.astype(jnp.bfloat16))    # bf16 weights: MXU-native
            shifts.append(sp)                          # f32 shifts: epilogue precision

        self.weights = weights
        self.shifts = shifts

    def forward(self, x):
        _, din = x.shape
        x_pad = jnp.pad(x, ((0, 0), (0, self.k0_pad - din))).astype(jnp.bfloat16)
        out_pad = densenet_forward(x_pad, self.weights, self.shifts,
                                   block_rows=self.block_rows,
                                   out_dtype=self.out_dtype)
        return out_pad[:, : self.d_output]

    # matched-precision pure-JAX reference (same bf16/f32 math, no Pallas)
    def forward_ref(self, x):
        _, din = x.shape
        h = jnp.pad(x, ((0, 0), (0, self.k0_pad - din))).astype(jnp.bfloat16)
        y = None
        for l in range(self.num_layers):
            y = jnp.dot(h, self.weights[l], preferred_element_type=jnp.float32)
            y = y + self.shifts[l]
            if l < self.num_layers - 1:
                y = jnp.maximum(y, 0.0)
                h = y.astype(jnp.bfloat16)
        return y.astype(self.out_dtype)[:, : self.d_output]

    # full-f32, unpadded reference (loose sanity check on the bf16 path)
    def forward_ref_f32(self, x):
        h = x
        for (W, shift, relu) in self.layers_f32:
            h = h @ W + shift
            if relu:
                h = jnp.maximum(h, 0.0)
        return h

    def prediction(self, sample):
        """Mirror of DenseNet.prediction (eval mode): normalize -> forward -> denorm."""
        norm = (jnp.asarray(sample, jnp.float32) - self.ab_norm[0]) / self.ab_norm[1]
        x = norm.reshape(-1, self.d_input)
        out = self.forward(x).astype(jnp.float32)
        return (out * self.Rs_parm[1] + self.Rs_parm[0]).reshape(-1)


if __name__ == "__main__":
    key = jax.random.PRNGKey(0)
    key, kx1, kx2 = jax.random.split(key, 3)

    d_input, d_output = 8, 4
    hidden_list = [32, 32]

    model = DenseNetPallas(
        d_input=d_input,
        d_output=d_output,
        hidden_list=hidden_list,
        drop_on=True,
        p_drop=0.1,
        batchnorm=True,
        ab_norm=(0.0, 1.0),
        Rs_parm=(0.0, 1.0),
        key=key,
        block_rows=512,
    )

    # --- small batch: single-tile grid ---
    x1 = jax.random.normal(kx1, (8, d_input), jnp.float32)
    out1 = jax.block_until_ready(model.forward(x1))
    assert out1.shape == (8, d_output)
    ref1 = model.forward_ref(x1)
    assert jnp.allclose(out1.astype(jnp.float32), ref1.astype(jnp.float32),
                        atol=3e-2, rtol=3e-2), "mismatch vs matched bf16 reference (B=8)"
    ref1_f32 = model.forward_ref_f32(x1)
    assert jnp.allclose(out1.astype(jnp.float32), ref1_f32,
                        atol=1e-1, rtol=1e-1), "mismatch vs f32 reference (B=8)"

    # --- larger batch: exercises the >=2-step 'parallel' batch grid (dual-TC on v7x) ---
    x2 = jax.random.normal(kx2, (192, d_input), jnp.float32)
    out2 = jax.block_until_ready(model.forward(x2))
    assert out2.shape == (192, d_output)
    ref2 = model.forward_ref(x2)
    assert jnp.allclose(out2.astype(jnp.float32), ref2.astype(jnp.float32),
                        atol=3e-2, rtol=3e-2), "mismatch vs matched bf16 reference (B=192)"

    # --- prediction() path (normalize -> forward -> denormalize) ---
    sample = jax.random.normal(key, (d_input,), jnp.float32)
    pred = jax.block_until_ready(model.prediction(sample))
    assert pred.shape == (d_output,)

    print("KERNEL_OK")
</pallas_src>

<mosaic_0001>
module attributes {stable_mosaic.version = 11 : i64} {
  func.func @_densenet_kernel(%arg0: i32, %arg1: memref<16x16xbf16, #tpu.memory_space<vmem>>, %arg2: memref<16x128xbf16, #tpu.memory_space<vmem>>, %arg3: memref<128x128xbf16, #tpu.memory_space<vmem>>, %arg4: memref<128x128xbf16, #tpu.memory_space<vmem>>, %arg5: memref<1x128xf32, #tpu.memory_space<vmem>>, %arg6: memref<1x128xf32, #tpu.memory_space<vmem>>, %arg7: memref<1x128xf32, #tpu.memory_space<vmem>>, %arg8: memref<16x128xbf16, #tpu.memory_space<vmem>>) attributes {dimension_semantics = [#tpu.dimension_semantics<parallel>], iteration_bounds = array<i64: 1>, scalar_prefetch = 0 : i64, scratch_operands = 0 : i64, tpu.core_type = #tpu.core_type<tc>, window_params = [{transform_indices = @transform_0, window_bounds = array<i64: 16, 16>}, {pipeline_mode = #tpu.pipeline_mode<synchronous>, transform_indices = @transform_1, window_bounds = array<i64: 16, 128>}, {pipeline_mode = #tpu.pipeline_mode<synchronous>, transform_indices = @transform_2, window_bounds = array<i64: 128, 128>}, {pipeline_mode = #tpu.pipeline_mode<synchronous>, transform_indices = @transform_3, window_bounds = array<i64: 128, 128>}, {pipeline_mode = #tpu.pipeline_mode<synchronous>, transform_indices = @transform_4, window_bounds = array<i64: 1, 128>}, {pipeline_mode = #tpu.pipeline_mode<synchronous>, transform_indices = @transform_5, window_bounds = array<i64: 1, 128>}, {pipeline_mode = #tpu.pipeline_mode<synchronous>, transform_indices = @transform_6, window_bounds = array<i64: 1, 128>}, {transform_indices = @transform_7, window_bounds = array<i64: 16, 128>}]} {
    %c0 = arith.constant 0 : index
    %c0_0 = arith.constant 0 : index
    %0 = vector.load %arg1[%c0, %c0_0] : memref<16x16xbf16, #tpu.memory_space<vmem>>, vector<16x16xbf16>
    %c0_1 = arith.constant 0 : index
    %c0_2 = arith.constant 0 : index
    %1 = vector.load %arg2[%c0_1, %c0_2] : memref<16x128xbf16, #tpu.memory_space<vmem>>, vector<16x128xbf16>
    %cst = arith.constant dense<0.000000e+00> : vector<16x128xf32>
    %2 = tpu.matmul %0, %1, %cst {dimension_numbers = #tpu.dot_dimension_numbers<[1], [0], [0], [1], [0, 0, 1, 1], [], []>} : vector<16x16xbf16>, vector<16x128xbf16>, vector<16x128xf32> -> vector<16x128xf32>
    %c0_3 = arith.constant 0 : index
    %c0_4 = arith.constant 0 : index
    %3 = vector.load %arg5[%c0_3, %c0_4] : memref<1x128xf32, #tpu.memory_space<vmem>>, vector<1x128xf32>
    %4 = vector.broadcast %3 : vector<1x128xf32> to vector<16x128xf32>
    %5 = arith.addf %2, %4 : vector<16x128xf32>
    %cst_5 = arith.constant 0.000000e+00 : f32
    %6 = vector.broadcast %cst_5 : f32 to vector<16x128xf32>
    %7 = arith.maximumf %5, %6 : vector<16x128xf32>
    %8 = arith.truncf %7 : vector<16x128xf32> to vector<16x128xbf16>
    %c0_6 = arith.constant 0 : index
    %c0_7 = arith.constant 0 : index
    %9 = vector.load %arg3[%c0_6, %c0_7] : memref<128x128xbf16, #tpu.memory_space<vmem>>, vector<128x128xbf16>
    %cst_8 = arith.constant dense<0.000000e+00> : vector<16x128xf32>
    %10 = tpu.matmul %8, %9, %cst_8 {dimension_numbers = #tpu.dot_dimension_numbers<[1], [0], [0], [1], [0, 0, 1, 1], [], []>} : vector<16x128xbf16>, vector<128x128xbf16>, vector<16x128xf32> -> vector<16x128xf32>
    %c0_9 = arith.constant 0 : index
    %c0_10 = arith.constant 0 : index
    %11 = vector.load %arg6[%c0_9, %c0_10] : memref<1x128xf32, #tpu.memory_space<vmem>>, vector<1x128xf32>
    %12 = vector.broadcast %11 : vector<1x128xf32> to vector<16x128xf32>
    %13 = arith.addf %10, %12 : vector<16x128xf32>
    %cst_11 = arith.constant 0.000000e+00 : f32
    %14 = vector.broadcast %cst_11 : f32 to vector<16x128xf32>
    %15 = arith.maximumf %13, %14 : vector<16x128xf32>
    %16 = arith.truncf %15 : vector<16x128xf32> to vector<16x128xbf16>
    %c0_12 = arith.constant 0 : index
    %c0_13 = arith.constant 0 : index
    %17 = vector.load %arg4[%c0_12, %c0_13] : memref<128x128xbf16, #tpu.memory_space<vmem>>, vector<128x128xbf16>
    %cst_14 = arith.constant dense<0.000000e+00> : vector<16x128xf32>
    %18 = tpu.matmul %16, %17, %cst_14 {dimension_numbers = #tpu.dot_dimension_numbers<[1], [0], [0], [1], [0, 0, 1, 1], [], []>} : vector<16x128xbf16>, vector<128x128xbf16>, vector<16x128xf32> -> vector<16x128xf32>
    %c0_15 = arith.constant 0 : index
    %c0_16 = arith.constant 0 : index
    %19 = vector.load %arg7[%c0_15, %c0_16] : memref<1x128xf32, #tpu.memory_space<vmem>>, vector<1x128xf32>
    %20 = vector.broadcast %19 : vector<1x128xf32> to vector<16x128xf32>
    %21 = arith.addf %18, %20 : vector<16x128xf32>
    %22 = arith.truncf %21 : vector<16x128xf32> to vector<16x128xbf16>
    %c0_17 = arith.constant 0 : index
    %c0_18 = arith.constant 0 : index
    %23 = vector.load %arg8[%c0_17, %c0_18] : memref<16x128xbf16, #tpu.memory_space<vmem>>, vector<16x128xbf16>
    tpu.vector_store %arg8[%c0_17, %c0_18], %22 {strides = array<i32>} : memref<16x128xbf16, #tpu.memory_space<vmem>>, vector<16x128xbf16>,
    return
  }
  func.func @transform_0(%arg0: i32) -> (i32, i32) {
    %c0_i32 = arith.constant 0 : i32
    %c0_i32_0 = arith.constant 0 : i32
    return %arg0, %c0_i32 : i32, i32
  }
  func.func @transform_1(%arg0: i32) -> (i32, i32) {
    %c0_i32 = arith.constant 0 : i32
    %c0_i32_0 = arith.constant 0 : i32
    %c0_i32_1 = arith.constant 0 : i32
    return %c0_i32, %c0_i32_0 : i32, i32
  }
  func.func @transform_2(%arg0: i32) -> (i32, i32) {
    %c0_i32 = arith.constant 0 : i32
    %c0_i32_0 = arith.constant 0 : i32
    %c0_i32_1 = arith.constant 0 : i32
    return %c0_i32, %c0_i32_0 : i32, i32
  }
  func.func @transform_3(%arg0: i32) -> (i32, i32) {
    %c0_i32 = arith.constant 0 : i32
    %c0_i32_0 = arith.constant 0 : i32
    %c0_i32_1 = arith.constant 0 : i32
    return %c0_i32, %c0_i32_0 : i32, i32
  }
  func.func @transform_4(%arg0: i32) -> (i32, i32) {
    %c0_i32 = arith.constant 0 : i32
    %c0_i32_0 = arith.constant 0 : i32
    %c0_i32_1 = arith.constant 0 : i32
    return %c0_i32, %c0_i32_0 : i32, i32
  }
  func.func @transform_5(%arg0: i32) -> (i32, i32) {
    %c0_i32 = arith.constant 0 : i32
    %c0_i32_0 = arith.constant 0 : i32
    %c0_i32_1 = arith.constant 0 : i32
    return %c0_i32, %c0_i32_0 : i32, i32
  }
  func.func @transform_6(%arg0: i32) -> (i32, i32) {
    %c0_i32 = arith.constant 0 : i32
    %c0_i32_0 = arith.constant 0 : i32
    %c0_i32_1 = arith.constant 0 : i32
    return %c0_i32, %c0_i32_0 : i32, i32
  }
  func.func @transform_7(%arg0: i32) -> (i32, i32) {
    %c0_i32 = arith.constant 0 : i32
    %c0_i32_0 = arith.constant 0 : i32
    return %arg0, %c0_i32 : i32, i32
  }
}

module attributes {stable_mosaic.version = 11 : i64} {
  func.func @_densenet_kernel(%arg0: i32, %arg1: memref<16x16xbf16, #tpu.memory_space<vmem>>, %arg2: memref<16x128xbf16, #tpu.memory_space<vmem>>, %arg3: memref<128x128xbf16, #tpu.memory_space<vmem>>, %arg4: memref<128x128xbf16, #tpu.memory_space<vmem>>, %arg5: memref<1x128xf32, #tpu.memory_space<vmem>>, %arg6: memref<1x128xf32, #tpu.memory_space<vmem>>, %arg7: memref<1x128xf32, #tpu.memory_space<vmem>>, %arg8: memref<16x128xbf16, #tpu.memory_space<vmem>>) attributes {dimension_semantics = [#tpu.dimension_semantics<parallel>], iteration_bounds = array<i64: 1>, scalar_prefetch = 0 : i64, scratch_operands = 0 : i64, tpu.core_type = #tpu.core_type<tc>, window_params = [{transform_indices = @transform_0, window_bounds = array<i64: 16, 16>}, {pipeline_mode = #tpu.pipeline_mode<synchronous>, transform_indices = @transform_1, window_bounds = array<i64: 16, 128>}, {pipeline_mode = #tpu.pipeline_mode<synchronous>, transform_indices = @transform_2, window_bounds = array<i64: 128, 128>}, {pipeline_mode = #tpu.pipeline_mode<synchronous>, transform_indices = @transform_3, window_bounds = array<i64: 128, 128>}, {pipeline_mode = #tpu.pipeline_mode<synchronous>, transform_indices = @transform_4, window_bounds = array<i64: 1, 128>}, {pipeline_mode = #tpu.pipeline_mode<synchronous>, transform_indices = @transform_5, window_bounds = array<i64: 1, 128>}, {pipeline_mode = #tpu.pipeline_mode<synchronous>, transform_indices = @transform_6, window_bounds = array<i64: 1, 128>}, {transform_indices = @transform_7, window_bounds = array<i64: 16, 128>}]} {
    %c0 = arith.constant 0 : index
    %c0_0 = arith.constant 0 : index
    %0 = vector.load %arg1[%c0, %c0_0] : memref<16x16xbf16, #tpu.memory_space<vmem>>, vector<16x16xbf16>
    %c0_1 = arith.constant 0 : index
    %c0_2 = arith.constant 0 : index
    %1 = vector.load %arg2[%c0_1, %c0_2] : memref<16x128xbf16, #tpu.memory_space<vmem>>, vector<16x128xbf16>
    %cst = arith.constant dense<0.000000e+00> : vector<16x128xf32>
    %2 = tpu.matmul %0, %1, %cst {dimension_numbers = #tpu.dot_dimension_numbers<[1], [0], [0], [1], [0, 0, 1, 1], [], []>} : vector<16x16xbf16>, vector<16x128xbf16>, vector<16x128xf32> -> vector<16x128xf32>
    %c0_3 = arith.constant 0 : index
    %c0_4 = arith.constant 0 : index
    %3 = vector.load %arg5[%c0_3, %c0_4] : memref<1x128xf32, #tpu.memory_space<vmem>>, vector<1x128xf32>
    %4 = vector.broadcast %3 : vector<1x128xf32> to vector<16x128xf32>
    %5 = arith.addf %2, %4 : vector<16x128xf32>
    %cst_5 = arith.constant 0.000000e+00 : f32
    %6 = vector.broadcast %cst_5 : f32 to vector<16x128xf32>
    %7 = arith.maximumf %5, %6 : vector<16x128xf32>
    %8 = arith.truncf %7 : vector<16x128xf32> to vector<16x128xbf16>
    %c0_6 = arith.constant 0 : index
    %c0_7 = arith.constant 0 : index
    %9 = vector.load %arg3[%c0_6, %c0_7] : memref<128x128xbf16, #tpu.memory_space<vmem>>, vector<128x128xbf16>
    %cst_8 = arith.constant dense<0.000000e+00> : vector<16x128xf32>
    %10 = tpu.matmul %8, %9, %cst_8 {dimension_numbers = #tpu.dot_dimension_numbers<[1], [0], [0], [1], [0, 0, 1, 1], [], []>} : vector<16x128xbf16>, vector<128x128xbf16>, vector<16x128xf32> -> vector<16x128xf32>
    %c0_9 = arith.constant 0 : index
    %c0_10 = arith.constant 0 : index
    %11 = vector.load %arg6[%c0_9, %c0_10] : memref<1x128xf32, #tpu.memory_space<vmem>>, vector<1x128xf32>
    %12 = vector.broadcast %11 : vector<1x128xf32> to vector<16x128xf32>
    %13 = arith.addf %10, %12 : vector<16x128xf32>
    %cst_11 = arith.constant 0.000000e+00 : f32
    %14 = vector.broadcast %cst_11 : f32 to vector<16x128xf32>
    %15 = arith.maximumf %13, %14 : vector<16x128xf32>
    %16 = arith.truncf %15 : vector<16x128xf32> to vector<16x128xbf16>
    %c0_12 = arith.constant 0 : index
    %c0_13 = arith.constant 0 : index
    %17 = vector.load %arg4[%c0_12, %c0_13] : memref<128x128xbf16, #tpu.memory_space<vmem>>, vector<128x128xbf16>
    %cst_14 = arith.constant dense<0.000000e+00> : vector<16x128xf32>
    %18 = tpu.matmul %16, %17, %cst_14 {dimension_numbers = #tpu.dot_dimension_numbers<[1], [0], [0], [1], [0, 0, 1, 1], [], []>} : vector<16x128xbf16>, vector<128x128xbf16>, vector<16x128xf32> -> vector<16x128xf32>
    %c0_15 = arith.constant 0 : index
    %c0_16 = arith.constant 0 : index
    %19 = vector.load %arg7[%c0_15, %c0_16] : memref<1x128xf32, #tpu.memory_space<vmem>>, vector<1x128xf32>
    %20 = vector.broadcast %19 : vector<1x128xf32> to vector<16x128xf32>
    %21 = arith.addf %18, %20 : vector<16x128xf32>
    %22 = arith.truncf %21 : vector<16x128xf32> to vector<16x128xbf16>
    %c0_17 = arith.constant 0 : index
    %c0_18 = arith.constant 0 : index
    %23 = vector.load %arg8[%c0_17, %c0_18] : memref<16x128xbf16, #tpu.memory_space<vmem>>, vector<16x128xbf16>
    tpu.vector_store %arg8[%c0_17, %c0_18], %22 {strides = array<i32>} : memref<16x128xbf16, #tpu.memory_space<vmem>>, vector<16x128xbf16>,
    return
  }
  func.func @transform_0(%arg0: i32) -> (i32, i32) {
    %c0_i32 = arith.constant 0 : i32
    %c0_i32_0 = arith.constant 0 : i32
    return %arg0, %c0_i32 : i32, i32
  }
  func.func @transform_1(%arg0: i32) -> (i32, i32) {
    %c0_i32 = arith.constant 0 : i32
    %c0_i32_0 = arith.constant 0 : i32
    %c0_i32_1 = arith.constant 0 : i32
    return %c0_i32, %c0_i32_0 : i32, i32
  }
  func.func @transform_2(%arg0: i32) -> (i32, i32) {
    %c0_i32 = arith.constant 0 : i32
    %c0_i32_0 = arith.constant 0 : i32
    %c0_i32_1 = arith.constant 0 : i32
    return %c0_i32, %c0_i32_0 : i32, i32
  }
  func.func @transform_3(%arg0: i32) -> (i32, i32) {
    %c0_i32 = arith.constant 0 : i32
    %c0_i32_0 = arith.constant 0 : i32
    %c0_i32_1 = arith.constant 0 : i32
    return %c0_i32, %c0_i32_0 : i32, i32
  }
  func.func @transform_4(%arg0: i32) -> (i32, i32) {
    %c0_i32 = arith.constant 0 : i32
    %c0_i32_0 = arith.constant 0 : i32
    %c0_i32_1 = arith.constant 0 : i32
    return %c0_i32, %c0_i32_0 : i32, i32
  }
  func.func @transform_5(%arg0: i32) -> (i32, i32) {
    %c0_i32 = arith.constant 0 : i32
    %c0_i32_0 = arith.constant 0 : i32
    %c0_i32_1 = arith.constant 0 : i32
    return %c0_i32, %c0_i32_0 : i32, i32
  }
  func.func @transform_6(%arg0: i32) -> (i32, i32) {
    %c0_i32 = arith.constant 0 : i32
    %c0_i32_0 = arith.constant 0 : i32
    %c0_i32_1 = arith.constant 0 : i32
    return %c0_i32, %c0_i32_0 : i32, i32
  }
  func.func @transform_7(%arg0: i32) -> (i32, i32) {
    %c0_i32 = arith.constant 0 : i32
    %c0_i32_0 = arith.constant 0 : i32
    return %arg0, %c0_i32 : i32, i32
  }
}

</mosaic_0001>

<bundles_post_ra>
// kernel: tpu_custom_call.1
= control target key start
LH: loop header
LB: loop body
LE: loop exit
PB: predicated region body
PF: predicated region fallthrough
CT: control target
= control target key end

     0   :  { %12 = vsyncpa [#allocation3], 0  ;;  %s749_s0 = inlined_call_operand.hbm [shape: bf16[16,16], index: 0, kind: input, shape index: {}]   ;;  %s750_s1 = inlined_call_operand.hbm [shape: bf16[16,128], index: 1, kind: input, shape index: {}]   ;;  %s751_s2 = inlined_call_operand.hbm [shape: bf16[128,128], index: 2, kind: input, shape index: {}]   ;;  %s752_s3 = inlined_call_operand.hbm [shape: bf16[128,128], index: 3, kind: input, shape index: {}]   ;;  %s753_s4 = inlined_call_operand.vmem [shape: f32[1,128], index: 4, kind: input, shape index: {}]   ;;  %s754_s5 = inlined_call_operand.vmem [shape: f32[1,128], index: 5, kind: input, shape index: {}]   ;;  %s755_s6 = inlined_call_operand.vmem [shape: f32[1,128], index: 6, kind: input, shape index: {}]   ;;  %s756_s7 = inlined_call_operand.hbm [shape: bf16[16,128], index: 7, kind: output, shape index: {}]  }
   0x1   :  { %13 = vsyncpa [#allocation6], 0 }
   0x2   :  { %14 = vsyncpa [#allocation9], 0 }
   0x3   :  { %15 = vsyncpa [#allocation4], 0  ;;  %s641_s24 = smov [#allocation5]   ;;  %s642_s26 = smov [#allocation2]  }
   0x4   :  { %s33_s25 = sshll.u32 %s641_s24, 4  ;;  %s21_s27 = sshll.u32 %s642_s26, 4  ;;  %s34_s25 = int_to_ptr.vmem [resolvable:$true] %s33_s25  ;;  %s22_s27 = int_to_ptr.vmem [resolvable:$true] %s21_s27 }
   0x5   :  { %s541_s28 = scalar_lea.vmem %s34_s25, 128  ;;  %p546_p1 = scmp.lt.s32.totalorder %s34_s25, %s34_s25 }
   0x6   :  { %p542_p0 = scmp.ne.s32.totalorder %s34_s25, %s541_s28  ;;  %p547_p2 = scmp.lt.s32.totalorder %s541_s28, %s541_s28 }
   0x8   :  { %p548_p3 = por %p547_p2, %p546_p1 }
   0xa   :  { %p549_p4 = pnand %p548_p3, %p542_p0 }
   0xc   :  { %552 = shalt.err (!%p549_p4)
}
   0xd   :  { %s643_s29 = smov 64   ;;  %s644_s30 = smov 4  }
   0xe   :  { %39 = dma.hbm_to_vmem [thread:$0]  %s750_s1, 128, %s34_s25, [#allocation6], %s643_s29, %s643_s29, %s644_s30  }
   0xf   :  { %s561_s10 = scalar_lea.vmem %s22_s27, 128  ;;  %p566_p6 = scmp.lt.s32.totalorder %s22_s27, %s22_s27 }
  0x10   :  { %p562_p5 = scmp.ne.s32.totalorder %s22_s27, %s561_s10  ;;  %p567_p7 = scmp.lt.s32.totalorder %s561_s10, %s561_s10 }
  0x12   :  { %p568_p8 = por %p567_p7, %p566_p6 }
  0x14   :  { %p569_p9 = pnand %p568_p8, %p562_p5 }
  0x16   :  { %572 = shalt.err (!%p569_p9)
}
  0x17   :  { %27 = dma.hbm_to_vmem [thread:$0]  %s749_s0, 128, %s22_s27, [#allocation3], %s643_s29, %s643_s29, %s644_s30  }
  0x18   :  { %s645_s13 = smov [#allocation7]   ;;  %s646_s15 = smov [#allocation8]  }
  0x19   :  { %s45_s14 = sshll.u32 %s645_s13, 4  ;;  %s57_s16 = sshll.u32 %s646_s15, 4  ;;  %s46_s14 = int_to_ptr.vmem [resolvable:$true] %s45_s14  ;;  %s58_s16 = int_to_ptr.vmem [resolvable:$true] %s57_s16 }
  0x1a   :  { %s581_s1 = scalar_lea.vmem %s46_s14, 1024  ;;  %p586_p11 = scmp.lt.s32.totalorder %s46_s14, %s46_s14 }
  0x1b   :  { %p582_p10 = scmp.ne.s32.totalorder %s46_s14, %s581_s1  ;;  %p587_p12 = scmp.lt.s32.totalorder %s581_s1, %s581_s1 }
  0x1d   :  { %p588_p13 = por %p587_p12, %p586_p11 }
  0x1f   :  { %p589_p0 = pnand %p588_p13, %p582_p10 }
  0x21   :  { %592 = shalt.err (!%p589_p0)
}
  0x22   :  { %51 = dma.hbm_to_vmem [thread:$0]  %s751_s2, 1024, %s46_s14, [#allocation6], %s643_s29, %s643_s29, %s644_s30  }
  0x23   :  { %s601_s0 = scalar_lea.vmem %s58_s16, 1024  ;;  %p606_p2 = scmp.lt.s32.totalorder %s58_s16, %s58_s16 }
  0x24   :  { %p602_p1 = scmp.ne.s32.totalorder %s58_s16, %s601_s0  ;;  %p607_p3 = scmp.lt.s32.totalorder %s601_s0, %s601_s0 }
  0x26   :  { %p608_p4 = por %p607_p3, %p606_p2 }
  0x28   :  { %p609_p5 = pnand %p608_p4, %p602_p1 }
  0x2a   :  { %612 = shalt.err (!%p609_p5)
}
  0x2b   :  { %63 = dma.hbm_to_vmem [thread:$0]  %s752_s3, 1024, %s58_s16, [#allocation9], %s643_s29, %s643_s29, %s644_s30  }
  0x2c   :  { %633 = dma.done.wait [#allocation3], 128  }
  0x2d   :  { %634 = vsyncadd [#allocation3], 4294967168 }
  0x2e   :  { %635 = dma.done.wait [#allocation6], 1152  }
  0x2f   :  { %636 = vsyncadd [#allocation6], 4294966144 }
  0x30   :  { %637 = dma.done.wait [#allocation9], 1024  }
  0x31   :  { %638 = vsyncadd [#allocation9], 4294966272  ;;  %v647_v0 = vmov 0.0   ;;  %vm648_vm0 = vmmov 0   ;;  %v515_v1 = vld [vmem:[#allocation5] sm:$0xff]   ;;  %v516_v2 = vld [vmem:[#allocation2] sm:$0xff]  }
  0x32   :  { %460 = vmatprep.subr.bf16.mxu0 %v647_v0  ;;  %462 = vmatprep.mubr.msk.bf16.mxu0 %vm648_vm0, %v647_v0  ;;  %vm105_vm1 = vcmask 130048   ;;  %v517_v3 = vld [vmem:[#allocation7 + $0x38] sm:$0xff]   ;;  %v518_v4 = vld [vmem:[#allocation7 + $0x30] sm:$0xff]   ;;  %v519_v5 = vld [vmem:[#allocation7 + $0x28] sm:$0xff]   ;;  %s649_s24 = smov [#allocation10]  }
  0x33   :  { %466 = vmatprep.subr.bf16.mxu1 %v647_v0  ;;  %482 = vmatprep.mubr.msk.bf16.mxu1 %vm648_vm0, %v647_v0  ;;  %v520_v6 = vld [vmem:[#allocation7 + $0x20] sm:$0xff]   ;;  %v521_v7 = vld [vmem:[#allocation7 + $0x18] sm:$0xff]   ;;  %v522_v8 = vld [vmem:[#allocation7 + $0x10] sm:$0xff]   ;;  %s395_s25 = sshll.u32 %s649_s24, 4  ;;  %s396_s25 = int_to_ptr.vmem [resolvable:$true] %s395_s25 }
  0x34   :  { %461 = vmatpush3.bf16.msra.mxu0 %v515_v1  ;;  %467 = vmatpush3.bf16.msra.mxu1 %v517_v3  ;;  %v523_v9 = vld [vmem:[#allocation7 + $0x8] sm:$0xff]   ;;  %v524_v10 = vld [vmem:[#allocation7] sm:$0xff]   ;;  %v525_v11 = vld [vmem:[#allocation8 + $0x38] sm:$0xff]   ;;  %p618_p7 = scmp.lt.s32.totalorder %s396_s25, %s396_s25 }
  0x35   :  { %486 = vmatprep.subr.bf16.mxu0 %v647_v0  ;;  %468 = vmatprep.subr.bf16.mxu1 %v647_v0  ;;  %v526_v12 = vld [vmem:[#allocation8 + $0x30] sm:$0xff]   ;;  %v527_v13 = vld [vmem:[#allocation8 + $0x28] sm:$0xff]   ;;  %v528_v14 = vld [vmem:[#allocation8 + $0x20] sm:$0xff]  }
  0x36   :  { %v529_v15 = vld [vmem:[#allocation8 + $0x18] sm:$0xff]   ;;  %v409_v16 = vld [vmem:[%s753_s4] ss:$0 sm:$0xff]  ;;  %v531_v27 = vld [vmem:[#allocation8 + $0x8] sm:$0xff]  }
  0x37   :  { %463 = vmatmul.mubr.msk.bf16.vlgmr.msra.gmra.mxu0 %vm105_vm1, %v516_v2  ;;  %v530_v26 = vld [vmem:[#allocation8 + $0x10] sm:$0xff]   ;;  %v532_v28 = vld [vmem:[#allocation8] sm:$0xff]  }
  0x38   :  { %502 = vmatprep.mubr.msk.bf16.mxu0 %vm648_vm0, %v647_v0  ;;  %469 = vmatpush3.bf16.msra.mxu1 %v518_v4  ;;  %v413_v29 = vld [vmem:[%s754_s5] ss:$0 sm:$0xff]  ;;  %s613_s5 = scalar_lea.vmem %s396_s25, 128 }
  0x39   :  { %470 = vmatprep.subr.bf16.mxu1 %v647_v0  ;;  %487 = vmatpush3.bf16.msra.mxu0 %v525_v11  ;;  %v422_v40 = vld [vmem:[%s755_s6] ss:$0 sm:$0xff]  ;;  %p614_p6 = scmp.ne.s32.totalorder %s396_s25, %s613_s5  ;;  %p619_p8 = scmp.lt.s32.totalorder %s613_s5, %s613_s5 }
  0x3a   :  { %488 = vmatprep.subr.bf16.mxu0 %v647_v0 }
  0x3b   :  { %p620_p9 = por %p619_p8, %p618_p7 }
  0x3c   :  { %471 = vmatpush3.bf16.msra.mxu1 %v519_v5 }
  0x3d   :  { %472 = vmatprep.subr.bf16.mxu1 %v647_v0  ;;  %489 = vmatpush3.bf16.msra.mxu0 %v526_v12  ;;  %p621_p10 = pnand %p620_p9, %p614_p6 }
  0x3e   :  { %490 = vmatprep.subr.bf16.mxu0 %v647_v0 }
  0x40   :  { %473 = vmatpush3.bf16.msra.mxu1 %v520_v6 }
  0x41   :  { %474 = vmatprep.subr.bf16.mxu1 %v647_v0  ;;  %491 = vmatpush3.bf16.msra.mxu0 %v527_v13 }
  0x42   :  { %492 = vmatprep.subr.bf16.mxu0 %v647_v0 }
  0x44   :  { %475 = vmatpush3.bf16.msra.mxu1 %v521_v7 }
  0x45   :  { %476 = vmatprep.subr.bf16.mxu1 %v647_v0  ;;  %493 = vmatpush3.bf16.msra.mxu0 %v528_v14 }
  0x46   :  { %494 = vmatprep.subr.bf16.mxu0 %v647_v0 }
  0x48   :  { %477 = vmatpush3.bf16.msra.mxu1 %v522_v8 }
  0x49   :  { %478 = vmatprep.subr.bf16.mxu1 %v647_v0  ;;  %495 = vmatpush3.bf16.msra.mxu0 %v529_v15 }
  0x4a   :  { %496 = vmatprep.subr.bf16.mxu0 %v647_v0 }
  0x4c   :  { %479 = vmatpush3.bf16.msra.mxu1 %v523_v9 }
  0x4d   :  { %480 = vmatprep.subr.bf16.mxu1 %v647_v0  ;;  %497 = vmatpush3.bf16.msra.mxu0 %v530_v26 }
  0x4e   :  { %498 = vmatprep.subr.bf16.mxu0 %v647_v0 }
  0x50   :  { %481 = vmatpush3.bf16.msra.mxu1 %v524_v10 }
  0x51   :  { %499 = vmatpush3.bf16.msra.mxu0 %v531_v27 }
  0x52   :  { %500 = vmatprep.subr.bf16.mxu0 %v647_v0 }
  0x55   :  { %501 = vmatpush3.bf16.msra.mxu0 %v532_v28 }
  0xf7   :  { %v143_v17 = vpop.f32.mrf.mxu0 }
  0xf8   :  { %v144_v19 = vadd.f32 %v409_v16, %v143_v17 }
  0xf9   :  { %v464_v18 = vpop.f32.mrf.mxu0 }
  0xfa   :  { %v150_v23 = vmax.f32 %v144_v19, 0.0 }
  0xfb   :  { %v146_v20 = vpop.f32.mrf.mxu0 }
  0xfc   :  { %v147_v21 = vadd.f32 %v409_v16, %v146_v20 }
  0xfd   :  { %v465_v22 = vpop.f32.mrf.mxu0 }
  0xfe   :  { %v151_v24 = vmax.f32 %v147_v21, 0.0 }
 0x100   :  { %v152_v25 = vpack.c.bf16 %v151_v24, %v150_v23 }
 0x102   :  { %483 = vmatmul.mubr.bf16.vlgmr.msra.gmra.mxu1 %v152_v25 }
 0x1c2   :  { %v258_v30 = vpop.f32.mrf.mxu1 }
 0x1c3   :  { %v259_v32 = vadd.f32 %v413_v29, %v258_v30 }
 0x1c4   :  { %v484_v31 = vpop.f32.mrf.mxu1 }
 0x1c5   :  { %v265_v36 = vmax.f32 %v259_v32, 0.0 }
 0x1c6   :  { %v261_v33 = vpop.f32.mrf.mxu1 }
 0x1c7   :  { %v262_v34 = vadd.f32 %v413_v29, %v261_v33 }
 0x1c8   :  { %v485_v35 = vpop.f32.mrf.mxu1 }
 0x1c9   :  { %v266_v37 = vmax.f32 %v262_v34, 0.0 }
 0x1cb   :  { %v267_v38 = vpack.c.bf16 %v266_v37, %v265_v36 }
 0x1cd   :  { %503 = vmatmul.mubr.bf16.vlgmr.msra.gmra.mxu0 %v267_v38 }
 0x28d   :  { %v373_v39 = vpop.f32.mrf.mxu0 }
 0x28e   :  { %v374_v43 = vadd.f32 %v422_v40, %v373_v39 }
 0x28f   :  { %v504_v41 = vpop.f32.mrf.mxu0 }
 0x291   :  { %v376_v42 = vpop.f32.mrf.mxu0 }
 0x292   :  { %v377_v44 = vadd.f32 %v422_v40, %v376_v42 }
 0x293   :  { %v505_v45 = vpop.f32.mrf.mxu0 }
 0x294   :  { %v438_v46 = vpack.c.bf16 %v377_v44, %v374_v43 }
 0x296   :  { %439 = vst [vmem:[#allocation10] sm:$0xff] %v438_v46  }
 0x297   :  { %624 = shalt.err (!%p621_p10)
}
 0x298   :  { %401 = dma.vmem_to_hbm [thread:$0]  %s396_s25, 128, %s756_s7, [#allocation4], %s643_s29, %s643_s29, %s644_s30  }
 0x299   :  { %639 = dma.done.wait [#allocation4], 128  }
 0x29a   :  { %640 = vsyncadd [#allocation4], 4294967168 }
 0x29b   :  { %405 = vsyncpa [#allocation3], 1 }
 0x29c   :  { %406 = vsyncpa [#allocation6], 1 }
 0x29d   :  { %407 = vsyncpa [#allocation9], 1 }
 0x29e   :  { %408 = vsyncpa [#allocation4], 1 }

// kernel: tpu_custom_call.1
= control target key start
LH: loop header
LB: loop body
LE: loop exit
PB: predicated region body
PF: predicated region fallthrough
CT: control target
= control target key end

     0   :  { %12 = vsyncpa [#allocation3], 0  ;;  %s749_s0 = inlined_call_operand.hbm [shape: bf16[16,16], index: 0, kind: input, shape index: {}]   ;;  %s750_s1 = inlined_call_operand.hbm [shape: bf16[16,128], index: 1, kind: input, shape index: {}]   ;;  %s751_s2 = inlined_call_operand.hbm [shape: bf16[128,128], index: 2, kind: input, shape index: {}]   ;;  %s752_s3 = inlined_call_operand.hbm [shape: bf16[128,128], index: 3, kind: input, shape index: {}]   ;;  %s753_s4 = inlined_call_operand.vmem [shape: f32[1,128], index: 4, kind: input, shape index: {}]   ;;  %s754_s5 = inlined_call_operand.vmem [shape: f32[1,128], index: 5, kind: input, shape index: {}]   ;;  %s755_s6 = inlined_call_operand.vmem [shape: f32[1,128], index: 6, kind: input, shape index: {}]   ;;  %s756_s7 = inlined_call_operand.hbm [shape: bf16[16,128], index: 7, kind: output, shape index: {}]  }
   0x1   :  { %13 = vsyncpa [#allocation6], 0 }
   0x2   :  { %14 = vsyncpa [#allocation9], 0 }
   0x3   :  { %15 = vsyncpa [#allocation4], 0  ;;  %s641_s24 = smov [#allocation5]   ;;  %s642_s26 = smov [#allocation2]  }
   0x4   :  { %s33_s25 = sshll.u32 %s641_s24, 4  ;;  %s21_s27 = sshll.u32 %s642_s26, 4  ;;  %s34_s25 = int_to_ptr.vmem [resolvable:$true] %s33_s25  ;;  %s22_s27 = int_to_ptr.vmem [resolvable:$true] %s21_s27 }
   0x5   :  { %s541_s28 = scalar_lea.vmem %s34_s25, 128  ;;  %p546_p1 = scmp.lt.s32.totalorder %s34_s25, %s34_s25 }
   0x6   :  { %p542_p0 = scmp.ne.s32.totalorder %s34_s25, %s541_s28  ;;  %p547_p2 = scmp.lt.s32.totalorder %s541_s28, %s541_s28 }
   0x8   :  { %p548_p3 = por %p547_p2, %p546_p1 }
   0xa   :  { %p549_p4 = pnand %p548_p3, %p542_p0 }
   0xc   :  { %552 = shalt.err (!%p549_p4)
}
   0xd   :  { %s643_s29 = smov 64   ;;  %s644_s30 = smov 4  }
   0xe   :  { %39 = dma.hbm_to_vmem [thread:$0]  %s750_s1, 128, %s34_s25, [#allocation6], %s643_s29, %s643_s29, %s644_s30  }
   0xf   :  { %s561_s10 = scalar_lea.vmem %s22_s27, 128  ;;  %p566_p6 = scmp.lt.s32.totalorder %s22_s27, %s22_s27 }
  0x10   :  { %p562_p5 = scmp.ne.s32.totalorder %s22_s27, %s561_s10  ;;  %p567_p7 = scmp.lt.s32.totalorder %s561_s10, %s561_s10 }
  0x12   :  { %p568_p8 = por %p567_p7, %p566_p6 }
  0x14   :  { %p569_p9 = pnand %p568_p8, %p562_p5 }
  0x16   :  { %572 = shalt.err (!%p569_p9)
}
  0x17   :  { %27 = dma.hbm_to_vmem [thread:$0]  %s749_s0, 128, %s22_s27, [#allocation3], %s643_s29, %s643_s29, %s644_s30  }
  0x18   :  { %s645_s13 = smov [#allocation7]   ;;  %s646_s15 = smov [#allocation8]  }
  0x19   :  { %s45_s14 = sshll.u32 %s645_s13, 4  ;;  %s57_s16 = sshll.u32 %s646_s15, 4  ;;  %s46_s14 = int_to_ptr.vmem [resolvable:$true] %s45_s14  ;;  %s58_s16 = int_to_ptr.vmem [resolvable:$true] %s57_s16 }
  0x1a   :  { %s581_s1 = scalar_lea.vmem %s46_s14, 1024  ;;  %p586_p11 = scmp.lt.s32.totalorder %s46_s14, %s46_s14 }
  0x1b   :  { %p582_p10 = scmp.ne.s32.totalorder %s46_s14, %s581_s1  ;;  %p587_p12 = scmp.lt.s32.totalorder %s581_s1, %s581_s1 }
  0x1d   :  { %p588_p13 = por %p587_p12, %p586_p11 }
  0x1f   :  { %p589_p0 = pnand %p588_p13, %p582_p10 }
  0x21   :  { %592 = shalt.err (!%p589_p0)
}
  0x22   :  { %51 = dma.hbm_to_vmem [thread:$0]  %s751_s2, 1024, %s46_s14, [#allocation6], %s643_s29, %s643_s29, %s644_s30  }
  0x23   :  { %s601_s0 = scalar_lea.vmem %s58_s16, 1024  ;;  %p606_p2 = scmp.lt.s32.totalorder %s58_s16, %s58_s16 }
  0x24   :  { %p602_p1 = scmp.ne.s32.totalorder %s58_s16, %s601_s0  ;;  %p607_p3 = scmp.lt.s32.totalorder %s601_s0, %s601_s0 }
  0x26   :  { %p608_p4 = por %p607_p3, %p606_p2 }
  0x28   :  { %p609_p5 = pnand %p608_p4, %p602_p1 }
  0x2a   :  { %612 = shalt.err (!%p609_p5)
}
  0x2b   :  { %63 = dma.hbm_to_vmem [thread:$0]  %s752_s3, 1024, %s58_s16, [#allocation9], %s643_s29, %s643_s29, %s644_s30  }
  0x2c   :  { %633 = dma.done.wait [#allocation3], 128  }
  0x2d   :  { %634 = vsyncadd [#allocation3], 4294967168 }
  0x2e   :  { %635 = dma.done.wait [#allocation6], 1152  }
  0x2f   :  { %636 = vsyncadd [#allocation6], 4294966144 }
  0x30   :  { %637 = dma.done.wait [#allocation9], 1024  }
  0x31   :  { %638 = vsyncadd [#allocation9], 4294966272  ;;  %v647_v0 = vmov 0.0   ;;  %vm648_vm0 = vmmov 0   ;;  %v515_v1 = vld [vmem:[#allocation5] sm:$0xff]   ;;  %v516_v2 = vld [vmem:[#allocation2] sm:$0xff]  }
  0x32   :  { %460 = vmatprep.subr.bf16.mxu0 %v647_v0  ;;  %462 = vmatprep.mubr.msk.bf16.mxu0 %vm648_vm0, %v647_v0  ;;  %vm105_vm1 = vcmask 130048   ;;  %v517_v3 = vld [vmem:[#allocation7 + $0x38] sm:$0xff]   ;;  %v518_v4 = vld [vmem:[#allocation7 + $0x30] sm:$0xff]   ;;  %v519_v5 = vld [vmem:[#allocation7 + $0x28] sm:$0xff]   ;;  %s649_s24 = smov [#allocation10]  }
  0x33   :  { %466 = vmatprep.subr.bf16.mxu1 %v647_v0  ;;  %482 = vmatprep.mubr.msk.bf16.mxu1 %vm648_vm0, %v647_v0  ;;  %v520_v6 = vld [vmem:[#allocation7 + $0x20] sm:$0xff]   ;;  %v521_v7 = vld [vmem:[#allocation7 + $0x18] sm:$0xff]   ;;  %v522_v8 = vld [vmem:[#allocation7 + $0x10] sm:$0xff]   ;;  %s395_s25 = sshll.u32 %s649_s24, 4  ;;  %s396_s25 = int_to_ptr.vmem [resolvable:$true] %s395_s25 }
  0x34   :  { %461 = vmatpush3.bf16.msra.mxu0 %v515_v1  ;;  %467 = vmatpush3.bf16.msra.mxu1 %v517_v3  ;;  %v523_v9 = vld [vmem:[#allocation7 + $0x8] sm:$0xff]   ;;  %v524_v10 = vld [vmem:[#allocation7] sm:$0xff]   ;;  %v525_v11 = vld [vmem:[#allocation8 + $0x38] sm:$0xff]   ;;  %p618_p7 = scmp.lt.s32.totalorder %s396_s25, %s396_s25 }
  0x35   :  { %486 = vmatprep.subr.bf16.mxu0 %v647_v0  ;;  %468 = vmatprep.subr.bf16.mxu1 %v647_v0  ;;  %v526_v12 = vld [vmem:[#allocation8 + $0x30] sm:$0xff]   ;;  %v527_v13 = vld [vmem:[#allocation8 + $0x28] sm:$0xff]   ;;  %v528_v14 = vld [vmem:[#allocation8 + $0x20] sm:$0xff]  }
  0x36   :  { %v529_v15 = vld [vmem:[#allocation8 + $0x18] sm:$0xff]   ;;  %v409_v16 = vld [vmem:[%s753_s4] ss:$0 sm:$0xff]  ;;  %v531_v27 = vld [vmem:[#allocation8 + $0x8] sm:$0xff]  }
  0x37   :  { %463 = vmatmul.mubr.msk.bf16.vlgmr.msra.gmra.mxu0 %vm105_vm1, %v516_v2  ;;  %v530_v26 = vld [vmem:[#allocation8 + $0x10] sm:$0xff]   ;;  %v532_v28 = vld [vmem:[#allocation8] sm:$0xff]  }
  0x38   :  { %502 = vmatprep.mubr.msk.bf16.mxu0 %vm648_vm0, %v647_v0  ;;  %469 = vmatpush3.bf16.msra.mxu1 %v518_v4  ;;  %v413_v29 = vld [vmem:[%s754_s5] ss:$0 sm:$0xff]  ;;  %s613_s5 = scalar_lea.vmem %s396_s25, 128 }
  0x39   :  { %470 = vmatprep.subr.bf16.mxu1 %v647_v0  ;;  %487 = vmatpush3.bf16.msra.mxu0 %v525_v11  ;;  %v422_v40 = vld [vmem:[%s755_s6] ss:$0 sm:$0xff]  ;;  %p614_p6 = scmp.ne.s32.totalorder %s396_s25, %s613_s5  ;;  %p619_p8 = scmp.lt.s32.totalorder %s613_s5, %s613_s5 }
  0x3a   :  { %488 = vmatprep.subr.bf16.mxu0 %v647_v0 }
  0x3b   :  { %p620_p9 = por %p619_p8, %p618_p7 }
  0x3c   :  { %471 = vmatpush3.bf16.msra.mxu1 %v519_v5 }
  0x3d   :  { %472 = vmatprep.subr.bf16.mxu1 %v647_v0  ;;  %489 = vmatpush3.bf16.msra.mxu0 %v526_v12  ;;  %p621_p10 = pnand %p620_p9, %p614_p6 }
  0x3e   :  { %490 = vmatprep.subr.bf16.mxu0 %v647_v0 }
  0x40   :  { %473 = vmatpush3.bf16.msra.mxu1 %v520_v6 }
  0x41   :  { %474 = vmatprep.subr.bf16.mxu1 %v647_v0  ;;  %491 = vmatpush3.bf16.msra.mxu0 %v527_v13 }
  0x42   :  { %492 = vmatprep.subr.bf16.mxu0 %v647_v0 }
  0x44   :  { %475 = vmatpush3.bf16.msra.mxu1 %v521_v7 }
  0x45   :  { %476 = vmatprep.subr.bf16.mxu1 %v647_v0  ;;  %493 = vmatpush3.bf16.msra.mxu0 %v528_v14 }
  0x46   :  { %494 = vmatprep.subr.bf16.mxu0 %v647_v0 }
  0x48   :  { %477 = vmatpush3.bf16.msra.mxu1 %v522_v8 }
  0x49   :  { %478 = vmatprep.subr.bf16.mxu1 %v647_v0  ;;  %495 = vmatpush3.bf16.msra.mxu0 %v529_v15 }
  0x4a   :  { %496 = vmatprep.subr.bf16.mxu0 %v647_v0 }
  0x4c   :  { %479 = vmatpush3.bf16.msra.mxu1 %v523_v9 }
  0x4d   :  { %480 = vmatprep.subr.bf16.mxu1 %v647_v0  ;;  %497 = vmatpush3.bf16.msra.mxu0 %v530_v26 }
  0x4e   :  { %498 = vmatprep.subr.bf16.mxu0 %v647_v0 }
  0x50   :  { %481 = vmatpush3.bf16.msra.mxu1 %v524_v10 }
  0x51   :  { %499 = vmatpush3.bf16.msra.mxu0 %v531_v27 }
  0x52   :  { %500 = vmatprep.subr.bf16.mxu0 %v647_v0 }
  0x55   :  { %501 = vmatpush3.bf16.msra.mxu0 %v532_v28 }
  0xf7   :  { %v143_v17 = vpop.f32.mrf.mxu0 }
  0xf8   :  { %v144_v19 = vadd.f32 %v409_v16, %v143_v17 }
  0xf9   :  { %v464_v18 = vpop.f32.mrf.mxu0 }
  0xfa   :  { %v150_v23 = vmax.f32 %v144_v19, 0.0 }
  0xfb   :  { %v146_v20 = vpop.f32.mrf.mxu0 }
  0xfc   :  { %v147_v21 = vadd.f32 %v409_v16, %v146_v20 }
  0xfd   :  { %v465_v22 = vpop.f32.mrf.mxu0 }
  0xfe   :  { %v151_v24 = vmax.f32 %v147_v21, 0.0 }
 0x100   :  { %v152_v25 = vpack.c.bf16 %v151_v24, %v150_v23 }
 0x102   :  { %483 = vmatmul.mubr.bf16.vlgmr.msra.gmra.mxu1 %v152_v25 }
 0x1c2   :  { %v258_v30 = vpop.f32.mrf.mxu1 }
 0x1c3   :  { %v259_v32 = vadd.f32 %v413_v29, %v258_v30 }
 0x1c4   :  { %v484_v31 = vpop.f32.mrf.mxu1 }
 0x1c5   :  { %v265_v36 = vmax.f32 %v259_v32, 0.0 }
 0x1c6   :  { %v261_v33 = vpop.f32.mrf.mxu1 }
 0x1c7   :  { %v262_v34 = vadd.f32 %v413_v29, %v261_v33 }
 0x1c8   :  { %v485_v35 = vpop.f32.mrf.mxu1 }
 0x1c9   :  { %v266_v37 = vmax.f32 %v262_v34, 0.0 }
 0x1cb   :  { %v267_v38 = vpack.c.bf16 %v266_v37, %v265_v36 }
 0x1cd   :  { %503 = vmatmul.mubr.bf16.vlgmr.msra.gmra.mxu0 %v267_v38 }
 0x28d   :  { %v373_v39 = vpop.f32.mrf.mxu0 }
 0x28e   :  { %v374_v43 = vadd.f32 %v422_v40, %v373_v39 }
 0x28f   :  { %v504_v41 = vpop.f32.mrf.mxu0 }
 0x291   :  { %v376_v42 = vpop.f32.mrf.mxu0 }
 0x292   :  { %v377_v44 = vadd.f32 %v422_v40, %v376_v42 }
 0x293   :  { %v505_v45 = vpop.f32.mrf.mxu0 }
 0x294   :  { %v438_v46 = vpack.c.bf16 %v377_v44, %v374_v43 }
 0x296   :  { %439 = vst [vmem:[#allocation10] sm:$0xff] %v438_v46  }
 0x297   :  { %624 = shalt.err (!%p621_p10)
}
 0x298   :  { %401 = dma.vmem_to_hbm [thread:$0]  %s396_s25, 128, %s756_s7, [#allocation4], %s643_s29, %s643_s29, %s644_s30  }
 0x299   :  { %639 = dma.done.wait [#allocation4], 128  }
 0x29a   :  { %640 = vsyncadd [#allocation4], 4294967168 }
 0x29b   :  { %405 = vsyncpa [#allocation3], 1 }
 0x29c   :  { %406 = vsyncpa [#allocation6], 1 }
 0x29d   :  { %407 = vsyncpa [#allocation9], 1 }
 0x29e   :  { %408 = vsyncpa [#allocation4], 1 }

</bundles_post_ra>
